<compile_context>
chip_gen: v7x
topology: tpu7x:2x2x1
jax: 0.10.0
libtpu: 0.0.40
codegen_flags: <defaults>
</compile_context>

<pallas_src>
import jax
import jax.numpy as jnp
from jax.experimental import pallas as pl
from jax.experimental.pallas import tpu as pltpu

_LANE_CANDIDATES = (1024, 512, 256, 128)   # lane-dense last dims (multiples of 128)
_BYTES_PER_BUFFER = 4 * 1024 * 1024        # ~4 MiB per pipeline buffer (dtype-aware rows)
_VMEM_LIMIT_FLOOR = 32 * 1024 * 1024       # raises v5e's 16 MiB default, safe on v7x's 64 MiB


def identity(x):
    """Pallas-project equivalent of Identity().forward(x).

    Identity needs no data movement, so the optimal implementation returns
    the input directly (free) rather than launching a copy kernel.
    """
    return x


def _copy_block_kernel(x_ref, o_ref):
    o_ref[...] = x_ref[...]


def _dma_copy_kernel(x_hbm, o_hbm, sem):
    # Single HBM->HBM DMA: no VMEM staging, no vld/vst bundle slots,
    # no TensorCore occupancy.
    copy = pltpu.make_async_copy(x_hbm, o_hbm, sem)
    copy.start()
    copy.wait()


def _mem_cost(total_bytes):
    # Pure memory traffic: read + write of every byte.
    return pl.CostEstimate(flops=0, transcendentals=0, bytes_accessed=2 * total_bytes)


def identity_copy_dma(x):
    """Materialized identity copy as one HBM->HBM DMA (zero VMEM footprint)."""
    if x.size == 0:
        return x
    total_bytes = int(x.size) * jnp.dtype(x.dtype).itemsize
    return pl.pallas_call(
        _dma_copy_kernel,
        out_shape=jax.ShapeDtypeStruct(x.shape, x.dtype),
        in_specs=[pl.BlockSpec(memory_space=pl.ANY)],
        out_specs=pl.BlockSpec(memory_space=pl.ANY),
        scratch_shapes=[pltpu.SemaphoreType.DMA(())],
        cost_estimate=_mem_cost(total_bytes),
    )(x)


def identity_copy_vmem(x, *, bytes_per_buffer=_BYTES_PER_BUFFER):
    """Materialized identity copy via a pipelined, lane-dense grid kernel.

    Used when the tensor is large enough to need multiple blocks; small or
    ragged inputs fall through to the direct HBM->HBM DMA copy.
    """
    orig_shape = x.shape
    total = int(x.size)
    if total == 0:
        return x
    itemsize = jnp.dtype(x.dtype).itemsize

    # Lane-dense reshape (free metadata op, no pad): largest lane width that
    # divides the element count exactly.
    lanes = next((l for l in _LANE_CANDIDATES if total % l == 0), None)
    if lanes is None:
        # Element count not a multiple of 128: a lane-dense reshape would need
        # pad + slice (an extra full HBM pass each).  The DMA copy handles any
        # shape at the same HBM roofline with no VMEM footprint.
        return identity_copy_dma(x)

    rows = total // lanes
    # Dtype-aware tile height: fixed byte budget per buffer, multiple of 8 sublanes.
    tm = max(8, (bytes_per_buffer // (lanes * itemsize)) // 8 * 8)
    if rows <= tm:
        # Single-block input: a 1-step grid would leave a v7x TensorCore idle
        # and pay full pipeline prologue/epilogue for us-scale work.
        return identity_copy_dma(x)

    x2 = x.reshape(rows, lanes)
    tile_bytes = tm * lanes * itemsize
    # 2x in + 2x out double buffers + headroom; floor raises v5e's 16 MiB
    # scoped default, stays well under v7x's 64 MiB physical VMEM.
    vmem_limit = max(_VMEM_LIMIT_FLOOR, 4 * tile_bytes + (8 << 20))

    out2 = pl.pallas_call(
        _copy_block_kernel,
        out_shape=jax.ShapeDtypeStruct((rows, lanes), x.dtype),
        # Ragged last block handled by Pallas masked writes — no pad/slice.
        grid=(pl.cdiv(rows, tm),),
        in_specs=[pl.BlockSpec((tm, lanes), lambda i: (i, 0))],
        out_specs=pl.BlockSpec((tm, lanes), lambda i: (i, 0)),
        compiler_params=pltpu.CompilerParams(
            # "parallel": shards the grid across the 2 TensorCores on v7x;
            # neutral on v5e/v6e (1 TC). Each block is independent.
            dimension_semantics=("parallel",),
            vmem_limit_bytes=vmem_limit,
        ),
        cost_estimate=_mem_cost(total * itemsize),
    )(x2)
    return out2.reshape(orig_shape)


if __name__ == "__main__":
    key = jax.random.PRNGKey(0)
    k0, k1, k2, k3 = jax.random.split(key, 4)

    # Shape implied by the GAN helper usage: NCHW activations.
    x = jax.random.normal(k0, (2, 4, 16, 16), dtype=jnp.float32)

    # 1. Real forward pass: free short-circuit.
    y = identity(x)
    assert y.shape == x.shape and y.dtype == x.dtype
    assert bool(jnp.array_equal(y, x))

    # 2. Materialized copy via direct HBM->HBM DMA.
    y_dma = identity_copy_dma(x)
    jax.block_until_ready(y_dma)
    assert y_dma.shape == x.shape and y_dma.dtype == x.dtype
    assert bool(jnp.array_equal(y_dma, x))

    # 3. Grid kernel, multi-block path (64 rows of 1024 lanes, tm=16 -> grid=4).
    x_big = jax.random.normal(k1, (16, 4, 32, 32), dtype=jnp.float32)
    y_big = identity_copy_vmem(x_big, bytes_per_buffer=64 * 1024)
    jax.block_until_ready(y_big)
    assert bool(jnp.array_equal(y_big, x_big))

    # 4. Grid kernel, ragged last block (72 rows, tm=16 -> grid=5, masked tail).
    x_rag = jax.random.normal(k2, (9, 8, 32, 32), dtype=jnp.float32)
    y_rag = identity_copy_vmem(x_rag, bytes_per_buffer=64 * 1024)
    jax.block_until_ready(y_rag)
    assert bool(jnp.array_equal(y_rag, x_rag))

    # 5. Unaligned total (not a multiple of 128) routes to the DMA copy.
    x_odd = jax.random.normal(k3, (3, 5, 7), dtype=jnp.float32)
    y_odd = identity_copy_vmem(x_odd)
    jax.block_until_ready(y_odd)
    assert y_odd.shape == x_odd.shape and y_odd.dtype == x_odd.dtype
    assert bool(jnp.array_equal(y_odd, x_odd))

    # 6. Default config on the small input: single block -> DMA fallback
    #    (no 1-step grid, keeps both v7x TCs free).
    y_small = identity_copy_vmem(x)
    jax.block_until_ready(y_small)
    assert bool(jnp.array_equal(y_small, x))

    print("KERNEL_OK")
</pallas_src>

<mosaic_0001>
module attributes {stable_mosaic.version = 11 : i64} {
  func.func @_dma_copy_kernel(%arg0: memref<2x4x16x16xf32, #tpu.memory_space<any>>, %arg1: memref<2x4x16x16xf32, #tpu.memory_space<any>>, %arg2: memref<!tpu.dma_semaphore, #tpu.memory_space<semaphore_mem>>) attributes {dimension_semantics = [], scalar_prefetch = 0 : i64, scratch_operands = 1 : i64, tpu.core_type = #tpu.core_type<tc>} {
    tpu.enqueue_dma source(%arg0 : memref<2x4x16x16xf32, #tpu.memory_space<any>>) target(%arg1 : memref<2x4x16x16xf32, #tpu.memory_space<any>>) target_semaphore(%arg2 : memref<!tpu.dma_semaphore, #tpu.memory_space<semaphore_mem>>)
    tpu.wait_dma2 semaphore(%arg2 : memref<!tpu.dma_semaphore, #tpu.memory_space<semaphore_mem>>) src(%arg0 : memref<2x4x16x16xf32, #tpu.memory_space<any>>) dst(%arg1 : memref<2x4x16x16xf32, #tpu.memory_space<any>>)
    return
  }
}

</mosaic_0001>

<bundles_post_ra>
// kernel: tpu_custom_call.1
= control target key start
LH: loop header
LB: loop body
LE: loop exit
PB: predicated region body
PF: predicated region fallthrough
CT: control target
= control target key end

     0   :  { %s36_s6 = smov [#allocation2]   ;;  %s37_s7 = smov [#allocation3]   ;;  %s55_s0 = inlined_call_operand.hbm [shape: f32[2,4,16,16], index: 0, kind: input, shape index: {}]   ;;  %s56_s1 = inlined_call_operand.hbm [shape: f32[2,4,16,16], index: 1, kind: output, shape index: {}]  }
   0x1   :  { %s38_s8 = smov 0  }
   0x2   :  { %18 = dma.general %s55_s0, 2048, %s56_s1, %s36_s6, %s37_s7, [#allocation4], %s38_s8, 0  }
   0x3   :  { %34 = dma.done.wait [#allocation2], 2048 }
   0x4   :  { %35 = vsyncadd [#allocation2], 4294965248 }
   0x5   :  { %24 = vsyncmov [#allocation2] }
   0x8   :  { %s25_s13 = vpop.sfrf %24 }
   0x9   :  { %p30_p0 = scmp.ne.s32.totalorder %s25_s13, 0 }
   0xb   :  { %29 = shalt.err (%p30_p0)  }

</bundles_post_ra>
